<compile_context>
chip_gen: v7x
topology: tpu7x:2x2x1
jax: 0.10.0
libtpu: 0.0.40
codegen_flags: <defaults>
</compile_context>

<pallas_src>
import jax
import jax.numpy as jnp
from jax.experimental import pallas as pl
from jax.experimental.pallas import tpu as pltpu

NEG_SLOPE = 0.01   # PyTorch leaky_relu default
K_IN = 75          # 3 * 5 * 5 flattened features
K_PAD = 128        # fc1 contraction dim padded 75 -> 128
OUT_DIM = 2        # fc4 true output width
OUT_PAD = 128      # fc4 output dim padded 2 -> 128 (lane-dense stores)


def _leaky_relu(x):
    return jnp.where(x > 0, x, NEG_SLOPE * x)


def _round_up(n, m):
    return (n + m - 1) // m * m


def mlp_kernel(x_ref, w1_ref, b1_ref, w2_ref, b2_ref,
               w3_ref, b3_ref, w4_ref, b4_ref, o_ref):
    # fc1 + leaky_relu   (bf16 MXU inputs, f32 accumulation / elementwise)
    h = jnp.dot(x_ref[...], w1_ref[...],
                preferred_element_type=jnp.float32) + b1_ref[...]
    h = _leaky_relu(h)
    # fc2 + leaky_relu
    h = jnp.dot(h.astype(jnp.bfloat16), w2_ref[...],
                preferred_element_type=jnp.float32) + b2_ref[...]
    h = _leaky_relu(h)
    # fc3 + leaky_relu
    h = jnp.dot(h.astype(jnp.bfloat16), w3_ref[...],
                preferred_element_type=jnp.float32) + b3_ref[...]
    h = _leaky_relu(h)
    # fc4 (no activation); padded-to-128 output -> unmasked lane-dense store
    out = jnp.dot(h.astype(jnp.bfloat16), w4_ref[...],
                  preferred_element_type=jnp.float32) + b4_ref[...]
    o_ref[...] = out.astype(o_ref.dtype)


def init_params(key):
    """f32 params mimicking PyTorch nn.Linear default init, stored as (in, out)."""
    dims = [(K_IN, 256), (256, 256), (256, 64), (64, OUT_DIM)]
    params = {}
    for i, (fan_in, fan_out) in enumerate(dims, start=1):
        key, kw, kb = jax.random.split(key, 3)
        bound = 1.0 / jnp.sqrt(float(fan_in))
        params[f"w{i}"] = jax.random.uniform(
            kw, (fan_in, fan_out), jnp.float32, -bound, bound)
        params[f"b{i}"] = jax.random.uniform(
            kb, (1, fan_out), jnp.float32, -bound, bound)
    return params


def prepare_params(params):
    """One-time glue: zero-pad fc1/fc4 to aligned shapes, cast weights to bf16."""
    w1 = (jnp.zeros((K_PAD, 256), jnp.float32)
          .at[:K_IN, :].set(params["w1"])).astype(jnp.bfloat16)
    w2 = params["w2"].astype(jnp.bfloat16)
    w3 = params["w3"].astype(jnp.bfloat16)
    w4 = (jnp.zeros((64, OUT_PAD), jnp.float32)
          .at[:, :OUT_DIM].set(params["w4"])).astype(jnp.bfloat16)
    b1 = params["b1"]
    b2 = params["b2"]
    b3 = params["b3"]
    b4 = jnp.zeros((1, OUT_PAD), jnp.float32).at[:, :OUT_DIM].set(params["b4"])
    return (w1, b1, w2, b2, w3, b3, w4, b4)


def net_forward(x, prepped):
    """x: (B, C, H, W) float32; prepped: output of prepare_params."""
    B = x.shape[0]
    x2d = x.reshape(B, -1)
    kin = x2d.shape[1]

    # Pad batch to a sublane multiple; tile over M if the batch is large.
    if B <= 128:
        tile_m = _round_up(max(B, 8), 8)
        m_pad = tile_m
    else:
        tile_m = 128
        m_pad = _round_up(B, tile_m)

    xp = jnp.zeros((m_pad, K_PAD), jnp.bfloat16)
    xp = xp.at[:B, :kin].set(x2d.astype(jnp.bfloat16))

    w1, b1, w2, b2, w3, b3, w4, b4 = prepped

    def pinned(shape):
        # Weights / biases stay VMEM-resident across all M grid steps.
        return pl.BlockSpec(shape, lambda i: (0, 0))

    out = pl.pallas_call(
        mlp_kernel,
        out_shape=jax.ShapeDtypeStruct((m_pad, OUT_PAD), jnp.float32),
        grid=(m_pad // tile_m,),
        in_specs=[
            pl.BlockSpec((tile_m, K_PAD), lambda i: (i, 0)),
            pinned(w1.shape), pinned(b1.shape),
            pinned(w2.shape), pinned(b2.shape),
            pinned(w3.shape), pinned(b3.shape),
            pinned(w4.shape), pinned(b4.shape),
        ],
        out_specs=pl.BlockSpec((tile_m, OUT_PAD), lambda i: (i, 0)),
        compiler_params=pltpu.CompilerParams(
            dimension_semantics=("parallel",)),
    )(xp, w1, b1, w2, b2, w3, b3, w4, b4)

    return out[:B, :OUT_DIM]


def reference_forward(x, prepped):
    """Pure-JAX reference using the same bf16-input / f32-accumulate numerics."""
    w1, b1, w2, b2, w3, b3, w4, b4 = prepped
    B = x.shape[0]
    h = x.reshape(B, -1)
    hp = jnp.zeros((B, K_PAD), jnp.float32).at[:, :K_IN].set(h).astype(jnp.bfloat16)
    z = jnp.dot(hp, w1, preferred_element_type=jnp.float32) + b1
    z = _leaky_relu(z)
    z = jnp.dot(z.astype(jnp.bfloat16), w2, preferred_element_type=jnp.float32) + b2
    z = _leaky_relu(z)
    z = jnp.dot(z.astype(jnp.bfloat16), w3, preferred_element_type=jnp.float32) + b3
    z = _leaky_relu(z)
    z = jnp.dot(z.astype(jnp.bfloat16), w4, preferred_element_type=jnp.float32) + b4
    return z[:, :OUT_DIM]


if __name__ == "__main__":
    key = jax.random.PRNGKey(0)
    key, kx = jax.random.split(key)
    # (B, C, H, W) = (2, 3, 5, 5) -> flatten -> 75 features, matching fc1.
    x = jax.random.normal(kx, (2, 3, 5, 5), jnp.float32)
    params = init_params(key)
    prepped = prepare_params(params)

    out = net_forward(x, prepped)
    out = jax.block_until_ready(out)

    ref = reference_forward(x, prepped)
    assert out.shape == (2, 2), out.shape
    assert jnp.allclose(out, ref, atol=2e-2, rtol=2e-2), "mismatch vs reference"
    print("KERNEL_OK")
</pallas_src>

<mosaic_0001>
module attributes {stable_mosaic.version = 11 : i64} {
  func.func @mlp_kernel(%arg0: i32, %arg1: memref<8x128xbf16, #tpu.memory_space<vmem>>, %arg2: memref<128x256xbf16, #tpu.memory_space<vmem>>, %arg3: memref<1x256xf32, #tpu.memory_space<vmem>>, %arg4: memref<256x256xbf16, #tpu.memory_space<vmem>>, %arg5: memref<1x256xf32, #tpu.memory_space<vmem>>, %arg6: memref<256x64xbf16, #tpu.memory_space<vmem>>, %arg7: memref<1x64xf32, #tpu.memory_space<vmem>>, %arg8: memref<64x128xbf16, #tpu.memory_space<vmem>>, %arg9: memref<1x128xf32, #tpu.memory_space<vmem>>, %arg10: memref<8x128xf32, #tpu.memory_space<vmem>>) attributes {dimension_semantics = [#tpu.dimension_semantics<parallel>], iteration_bounds = array<i64: 1>, scalar_prefetch = 0 : i64, scratch_operands = 0 : i64, tpu.core_type = #tpu.core_type<tc>, window_params = [{transform_indices = @transform_0, window_bounds = array<i64: 8, 128>}, {pipeline_mode = #tpu.pipeline_mode<synchronous>, transform_indices = @transform_1, window_bounds = array<i64: 128, 256>}, {pipeline_mode = #tpu.pipeline_mode<synchronous>, transform_indices = @transform_2, window_bounds = array<i64: 1, 256>}, {pipeline_mode = #tpu.pipeline_mode<synchronous>, transform_indices = @transform_3, window_bounds = array<i64: 256, 256>}, {pipeline_mode = #tpu.pipeline_mode<synchronous>, transform_indices = @transform_4, window_bounds = array<i64: 1, 256>}, {pipeline_mode = #tpu.pipeline_mode<synchronous>, transform_indices = @transform_5, window_bounds = array<i64: 256, 64>}, {pipeline_mode = #tpu.pipeline_mode<synchronous>, transform_indices = @transform_6, window_bounds = array<i64: 1, 64>}, {pipeline_mode = #tpu.pipeline_mode<synchronous>, transform_indices = @transform_7, window_bounds = array<i64: 64, 128>}, {pipeline_mode = #tpu.pipeline_mode<synchronous>, transform_indices = @transform_8, window_bounds = array<i64: 1, 128>}, {transform_indices = @transform_9, window_bounds = array<i64: 8, 128>}]} {
    %c0 = arith.constant 0 : index
    %c0_0 = arith.constant 0 : index
    %0 = vector.load %arg1[%c0, %c0_0] : memref<8x128xbf16, #tpu.memory_space<vmem>>, vector<8x128xbf16>
    %c0_1 = arith.constant 0 : index
    %c0_2 = arith.constant 0 : index
    %1 = vector.load %arg2[%c0_1, %c0_2] : memref<128x256xbf16, #tpu.memory_space<vmem>>, vector<128x256xbf16>
    %cst = arith.constant dense<0.000000e+00> : vector<8x256xf32>
    %2 = tpu.matmul %0, %1, %cst {dimension_numbers = #tpu.dot_dimension_numbers<[1], [0], [0], [1], [0, 0, 1, 1], [], []>} : vector<8x128xbf16>, vector<128x256xbf16>, vector<8x256xf32> -> vector<8x256xf32>
    %c0_3 = arith.constant 0 : index
    %c0_4 = arith.constant 0 : index
    %3 = vector.load %arg3[%c0_3, %c0_4] : memref<1x256xf32, #tpu.memory_space<vmem>>, vector<1x256xf32>
    %4 = vector.broadcast %3 : vector<1x256xf32> to vector<8x256xf32>
    %5 = arith.addf %2, %4 : vector<8x256xf32>
    %cst_5 = arith.constant 0.000000e+00 : f32
    %6 = vector.broadcast %cst_5 : f32 to vector<8x256xf32>
    %7 = arith.cmpf ogt, %5, %6 : vector<8x256xf32>
    %cst_6 = arith.constant 0.00999999977 : f32
    %8 = vector.broadcast %cst_6 : f32 to vector<8x256xf32>
    %9 = arith.mulf %8, %5 : vector<8x256xf32>
    %10 = arith.select %7, %5, %9 : vector<8x256xi1>, vector<8x256xf32>
    %11 = arith.truncf %10 : vector<8x256xf32> to vector<8x256xbf16>
    %c0_7 = arith.constant 0 : index
    %c0_8 = arith.constant 0 : index
    %12 = vector.load %arg4[%c0_7, %c0_8] : memref<256x256xbf16, #tpu.memory_space<vmem>>, vector<256x256xbf16>
    %cst_9 = arith.constant dense<0.000000e+00> : vector<8x256xf32>
    %13 = tpu.matmul %11, %12, %cst_9 {dimension_numbers = #tpu.dot_dimension_numbers<[1], [0], [0], [1], [0, 0, 1, 1], [], []>} : vector<8x256xbf16>, vector<256x256xbf16>, vector<8x256xf32> -> vector<8x256xf32>
    %c0_10 = arith.constant 0 : index
    %c0_11 = arith.constant 0 : index
    %14 = vector.load %arg5[%c0_10, %c0_11] : memref<1x256xf32, #tpu.memory_space<vmem>>, vector<1x256xf32>
    %15 = vector.broadcast %14 : vector<1x256xf32> to vector<8x256xf32>
    %16 = arith.addf %13, %15 : vector<8x256xf32>
    %cst_12 = arith.constant 0.000000e+00 : f32
    %17 = vector.broadcast %cst_12 : f32 to vector<8x256xf32>
    %18 = arith.cmpf ogt, %16, %17 : vector<8x256xf32>
    %cst_13 = arith.constant 0.00999999977 : f32
    %19 = vector.broadcast %cst_13 : f32 to vector<8x256xf32>
    %20 = arith.mulf %19, %16 : vector<8x256xf32>
    %21 = arith.select %18, %16, %20 : vector<8x256xi1>, vector<8x256xf32>
    %22 = arith.truncf %21 : vector<8x256xf32> to vector<8x256xbf16>
    %c0_14 = arith.constant 0 : index
    %c0_15 = arith.constant 0 : index
    %23 = vector.load %arg6[%c0_14, %c0_15] : memref<256x64xbf16, #tpu.memory_space<vmem>>, vector<256x64xbf16>
    %cst_16 = arith.constant dense<0.000000e+00> : vector<8x64xf32>
    %24 = tpu.matmul %22, %23, %cst_16 {dimension_numbers = #tpu.dot_dimension_numbers<[1], [0], [0], [1], [0, 0, 1, 1], [], []>} : vector<8x256xbf16>, vector<256x64xbf16>, vector<8x64xf32> -> vector<8x64xf32>
    %c0_17 = arith.constant 0 : index
    %c0_18 = arith.constant 0 : index
    %25 = vector.load %arg7[%c0_17, %c0_18] : memref<1x64xf32, #tpu.memory_space<vmem>>, vector<1x64xf32>
    %26 = vector.broadcast %25 : vector<1x64xf32> to vector<8x64xf32>
    %27 = arith.addf %24, %26 : vector<8x64xf32>
    %cst_19 = arith.constant 0.000000e+00 : f32
    %28 = vector.broadcast %cst_19 : f32 to vector<8x64xf32>
    %29 = arith.cmpf ogt, %27, %28 : vector<8x64xf32>
    %cst_20 = arith.constant 0.00999999977 : f32
    %30 = vector.broadcast %cst_20 : f32 to vector<8x64xf32>
    %31 = arith.mulf %30, %27 : vector<8x64xf32>
    %32 = arith.select %29, %27, %31 : vector<8x64xi1>, vector<8x64xf32>
    %33 = arith.truncf %32 : vector<8x64xf32> to vector<8x64xbf16>
    %c0_21 = arith.constant 0 : index
    %c0_22 = arith.constant 0 : index
    %34 = vector.load %arg8[%c0_21, %c0_22] : memref<64x128xbf16, #tpu.memory_space<vmem>>, vector<64x128xbf16>
    %cst_23 = arith.constant dense<0.000000e+00> : vector<8x128xf32>
    %35 = tpu.matmul %33, %34, %cst_23 {dimension_numbers = #tpu.dot_dimension_numbers<[1], [0], [0], [1], [0, 0, 1, 1], [], []>} : vector<8x64xbf16>, vector<64x128xbf16>, vector<8x128xf32> -> vector<8x128xf32>
    %c0_24 = arith.constant 0 : index
    %c0_25 = arith.constant 0 : index
    %36 = vector.load %arg9[%c0_24, %c0_25] : memref<1x128xf32, #tpu.memory_space<vmem>>, vector<1x128xf32>
    %37 = vector.broadcast %36 : vector<1x128xf32> to vector<8x128xf32>
    %38 = arith.addf %35, %37 : vector<8x128xf32>
    %c0_26 = arith.constant 0 : index
    %c0_27 = arith.constant 0 : index
    %39 = vector.load %arg10[%c0_26, %c0_27] : memref<8x128xf32, #tpu.memory_space<vmem>>, vector<8x128xf32>
    tpu.vector_store %arg10[%c0_26, %c0_27], %38 {strides = array<i32>} : memref<8x128xf32, #tpu.memory_space<vmem>>, vector<8x128xf32>,
    return
  }
  func.func @transform_0(%arg0: i32) -> (i32, i32) {
    %c0_i32 = arith.constant 0 : i32
    %c0_i32_0 = arith.constant 0 : i32
    return %arg0, %c0_i32 : i32, i32
  }
  func.func @transform_1(%arg0: i32) -> (i32, i32) {
    %c0_i32 = arith.constant 0 : i32
    %c0_i32_0 = arith.constant 0 : i32
    %c0_i32_1 = arith.constant 0 : i32
    return %c0_i32, %c0_i32_0 : i32, i32
  }
  func.func @transform_2(%arg0: i32) -> (i32, i32) {
    %c0_i32 = arith.constant 0 : i32
    %c0_i32_0 = arith.constant 0 : i32
    %c0_i32_1 = arith.constant 0 : i32
    return %c0_i32, %c0_i32_0 : i32, i32
  }
  func.func @transform_3(%arg0: i32) -> (i32, i32) {
    %c0_i32 = arith.constant 0 : i32
    %c0_i32_0 = arith.constant 0 : i32
    %c0_i32_1 = arith.constant 0 : i32
    return %c0_i32, %c0_i32_0 : i32, i32
  }
  func.func @transform_4(%arg0: i32) -> (i32, i32) {
    %c0_i32 = arith.constant 0 : i32
    %c0_i32_0 = arith.constant 0 : i32
    %c0_i32_1 = arith.constant 0 : i32
    return %c0_i32, %c0_i32_0 : i32, i32
  }
  func.func @transform_5(%arg0: i32) -> (i32, i32) {
    %c0_i32 = arith.constant 0 : i32
    %c0_i32_0 = arith.constant 0 : i32
    %c0_i32_1 = arith.constant 0 : i32
    return %c0_i32, %c0_i32_0 : i32, i32
  }
  func.func @transform_6(%arg0: i32) -> (i32, i32) {
    %c0_i32 = arith.constant 0 : i32
    %c0_i32_0 = arith.constant 0 : i32
    %c0_i32_1 = arith.constant 0 : i32
    return %c0_i32, %c0_i32_0 : i32, i32
  }
  func.func @transform_7(%arg0: i32) -> (i32, i32) {
    %c0_i32 = arith.constant 0 : i32
    %c0_i32_0 = arith.constant 0 : i32
    %c0_i32_1 = arith.constant 0 : i32
    return %c0_i32, %c0_i32_0 : i32, i32
  }
  func.func @transform_8(%arg0: i32) -> (i32, i32) {
    %c0_i32 = arith.constant 0 : i32
    %c0_i32_0 = arith.constant 0 : i32
    %c0_i32_1 = arith.constant 0 : i32
    return %c0_i32, %c0_i32_0 : i32, i32
  }
  func.func @transform_9(%arg0: i32) -> (i32, i32) {
    %c0_i32 = arith.constant 0 : i32
    %c0_i32_0 = arith.constant 0 : i32
    return %arg0, %c0_i32 : i32, i32
  }
}

</mosaic_0001>

<bundles_post_ra>
// kernel: tpu_custom_call.1
= control target key start
LH: loop header
LB: loop body
LE: loop exit
PB: predicated region body
PF: predicated region fallthrough
CT: control target
= control target key end

     0   :  { %14 = vsyncpa [#allocation3], 0  ;;  %s1198_s0 = inlined_call_operand.vmem [shape: bf16[8,128], index: 0, kind: input, shape index: {}]   ;;  %s1199_s1 = inlined_call_operand.vmem [shape: bf16[128,256], index: 1, kind: input, shape index: {}]   ;;  %s1200_s2 = inlined_call_operand.vmem [shape: f32[1,256], index: 2, kind: input, shape index: {}]   ;;  %s1201_s3 = inlined_call_operand.hbm [shape: bf16[256,256], index: 3, kind: input, shape index: {}]   ;;  %s1202_s4 = inlined_call_operand.vmem [shape: f32[1,256], index: 4, kind: input, shape index: {}]   ;;  %s1203_s5 = inlined_call_operand.vmem [shape: bf16[256,64], index: 5, kind: input, shape index: {}]   ;;  %s1204_s6 = inlined_call_operand.vmem [shape: f32[1,64], index: 6, kind: input, shape index: {}]   ;;  %s1205_s7 = inlined_call_operand.vmem [shape: bf16[64,128], index: 7, kind: input, shape index: {}]   ;;  %s1206_s8 = inlined_call_operand.vmem [shape: f32[1,128], index: 8, kind: input, shape index: {}]   ;;  %s1207_s9 = inlined_call_operand.hbm [shape: f32[8,128], index: 9, kind: output, shape index: {}]  }
   0x1   :  { %15 = vsyncpa [#allocation4], 0  ;;  %s994_s30 = smov [#allocation2]   ;;  %s946_s13 = scalar_lea.hbm %s1201_s3, 4096 }
   0x2   :  { %s27_s10 = sshll.u32 %s994_s30, 4  ;;  %p947_p0 = scmp.ne.s32.totalorder %s1201_s3, %s946_s13  ;;  %s28_s10 = int_to_ptr.vmem [resolvable:$true] %s27_s10 }
   0x3   :  { %p950_p1 = scmp.lt.u32.totalorder %s946_s13, %s1201_s3 }
   0x5   :  { %p952_p2 = pnand %p950_p1, %p947_p0 }
   0x7   :  { %955 = shalt.err (!%p952_p2)
}
   0x8   :  { %s956_s18 = scalar_lea.vmem %s28_s10, 4096  ;;  %p961_p4 = scmp.lt.s32.totalorder %s28_s10, %s28_s10 }
   0x9   :  { %p957_p3 = scmp.ne.s32.totalorder %s28_s10, %s956_s18  ;;  %p962_p5 = scmp.lt.s32.totalorder %s956_s18, %s956_s18 }
   0xb   :  { %p963_p6 = por %p962_p5, %p961_p4 }
   0xd   :  { %p964_p7 = pnand %p963_p6, %p957_p3 }
   0xf   :  { %967 = shalt.err (!%p964_p7)
}
  0x10   :  { %s995_s19 = smov 128   ;;  %s996_s20 = smov 8  }
  0x11   :  { %33 = dma.hbm_to_vmem [thread:$0]  %s1201_s3, 4096, %s28_s10, [#allocation3], %s995_s19, %s995_s19, %s996_s20  }
  0x12   :  { %990 = dma.done.wait [#allocation3], 4096  }
  0x13   :  { %991 = vsyncadd [#allocation3], 4294963200  ;;  %v997_v0 = vmov 0   ;;  %v854_v1 = vld [vmem:[%s1199_s1 + $0x4] ss:$8 sps:$4 sm:$0xff]   ;;  %v930_v54 = vld [vmem:[%s1203_s5 + $0x50] sm:$0xff]   ;;  %v67_v62 = vlaneseq }
  0x14   :  { %189 = vmatprep.mubr.bf16.mxu0 %v997_v0  ;;  %v856_v2 = vld [vmem:[%s1199_s1] ss:$8 sps:$4 sm:$0xff]   ;;  %157 = vmatprep.subr.bf16.mxu0 %v854_v1  ;;  %v857_v3 = vld [vmem:[%s1199_s1 + $0x14] ss:$8 sps:$4 sm:$0xff]   ;;  %v859_v4 = vld [vmem:[%s1199_s1 + $0x10] ss:$8 sps:$4 sm:$0xff]  }
  0x15   :  { %158 = vmatpush1.bf16.msra.mxu0 %v856_v2  ;;  %v860_v5 = vld [vmem:[%s1199_s1 + $0x24] ss:$8 sps:$4 sm:$0xff]   ;;  %v862_v6 = vld [vmem:[%s1199_s1 + $0x20] ss:$8 sps:$4 sm:$0xff]   ;;  %v863_v7 = vld [vmem:[%s1199_s1 + $0x34] ss:$8 sps:$4 sm:$0xff]  }
  0x16   :  { %159 = vmatprep.subr.bf16.mxu0 %v857_v3  ;;  %v865_v8 = vld [vmem:[%s1199_s1 + $0x30] ss:$8 sps:$4 sm:$0xff]   ;;  %v866_v9 = vld [vmem:[%s1199_s1 + $0x44] ss:$8 sps:$4 sm:$0xff]   ;;  %v880_v11 = vld [vmem:[#allocation2] ss:$8 sps:$4 sm:$0xff]  }
  0x17   :  { %v878_v10 = vld [vmem:[#allocation2 + $0x4] ss:$8 sps:$4 sm:$0xff]   ;;  %v881_v12 = vld [vmem:[#allocation2 + $0x14] ss:$8 sps:$4 sm:$0xff]   ;;  %v868_v13 = vld [vmem:[%s1199_s1 + $0x40] ss:$8 sps:$4 sm:$0xff]  }
  0x18   :  { %410 = vmatprep.subr.bf16.mxu1 %v878_v10  ;;  %v883_v14 = vld [vmem:[#allocation2 + $0x10] ss:$8 sps:$4 sm:$0xff]   ;;  %v884_v15 = vld [vmem:[#allocation2 + $0x24] ss:$8 sps:$4 sm:$0xff]   ;;  %v869_v16 = vld [vmem:[%s1199_s1 + $0x54] ss:$8 sps:$4 sm:$0xff]  }
  0x19   :  { %160 = vmatpush1.bf16.msra.mxu0 %v859_v4  ;;  %411 = vmatpush1.bf16.msra.mxu1 %v880_v11  ;;  %v871_v17 = vld [vmem:[%s1199_s1 + $0x50] ss:$8 sps:$4 sm:$0xff]   ;;  %v886_v18 = vld [vmem:[#allocation2 + $0x20] ss:$8 sps:$4 sm:$0xff]   ;;  %v887_v19 = vld [vmem:[#allocation2 + $0x34] ss:$8 sps:$4 sm:$0xff]  }
  0x1a   :  { %161 = vmatprep.subr.bf16.mxu0 %v860_v5  ;;  %412 = vmatprep.subr.bf16.mxu1 %v881_v12  ;;  %v872_v20 = vld [vmem:[%s1199_s1 + $0x64] ss:$8 sps:$4 sm:$0xff]   ;;  %v874_v21 = vld [vmem:[%s1199_s1 + $0x60] ss:$8 sps:$4 sm:$0xff]   ;;  %v889_v22 = vld [vmem:[#allocation2 + $0x30] ss:$8 sps:$4 sm:$0xff]  }
  0x1b   :  { %v890_v23 = vld [vmem:[#allocation2 + $0x44] ss:$8 sps:$4 sm:$0xff]   ;;  %v875_v24 = vld [vmem:[%s1199_s1 + $0x74] ss:$8 sps:$4 sm:$0xff]   ;;  %v877_v25 = vld [vmem:[%s1199_s1 + $0x70] ss:$8 sps:$4 sm:$0xff]  }
  0x1c   :  { %v892_v26 = vld [vmem:[#allocation2 + $0x40] ss:$8 sps:$4 sm:$0xff]   ;;  %v893_v27 = vld [vmem:[#allocation2 + $0x54] ss:$8 sps:$4 sm:$0xff]   ;;  %v895_v29 = vld [vmem:[#allocation2 + $0x50] ss:$8 sps:$4 sm:$0xff]  }
  0x1d   :  { %162 = vmatpush1.bf16.msra.mxu0 %v862_v6  ;;  %413 = vmatpush1.bf16.msra.mxu1 %v883_v14  ;;  %v48_v28 = vld [vmem:[%s1198_s0] sm:$0xf]  ;;  %v896_v30 = vld [vmem:[#allocation2 + $0x64] ss:$8 sps:$4 sm:$0xff]   ;;  %v899_v32 = vld [vmem:[#allocation2 + $0x74] ss:$8 sps:$4 sm:$0xff]  }
  0x1e   :  { %163 = vmatprep.subr.bf16.mxu0 %v863_v7  ;;  %414 = vmatprep.subr.bf16.mxu1 %v884_v15  ;;  %v898_v31 = vld [vmem:[#allocation2 + $0x60] ss:$8 sps:$4 sm:$0xff]   ;;  %v901_v33 = vld [vmem:[#allocation2 + $0x70] ss:$8 sps:$4 sm:$0xff]   ;;  %v902_v34 = vld [vmem:[#allocation2 + $0x84] ss:$8 sps:$4 sm:$0xff]  }
  0x1f   :  { %v904_v35 = vld [vmem:[#allocation2 + $0x80] ss:$8 sps:$4 sm:$0xff]   ;;  %v905_v36 = vld [vmem:[#allocation2 + $0x94] ss:$8 sps:$4 sm:$0xff]   ;;  %v907_v37 = vld [vmem:[#allocation2 + $0x90] ss:$8 sps:$4 sm:$0xff]  }
  0x20   :  { %v908_v38 = vld [vmem:[#allocation2 + $0xa4] ss:$8 sps:$4 sm:$0xff]   ;;  %v910_v39 = vld [vmem:[#allocation2 + $0xa0] ss:$8 sps:$4 sm:$0xff]   ;;  %v911_v40 = vld [vmem:[#allocation2 + $0xb4] ss:$8 sps:$4 sm:$0xff]  }
  0x21   :  { %164 = vmatpush1.bf16.msra.mxu0 %v865_v8  ;;  %415 = vmatpush1.bf16.msra.mxu1 %v886_v18  ;;  %v913_v41 = vld [vmem:[#allocation2 + $0xb0] ss:$8 sps:$4 sm:$0xff]   ;;  %v914_v42 = vld [vmem:[#allocation2 + $0xc4] ss:$8 sps:$4 sm:$0xff]   ;;  %v916_v43 = vld [vmem:[#allocation2 + $0xc0] ss:$8 sps:$4 sm:$0xff]  }
  0x22   :  { %165 = vmatprep.subr.bf16.mxu0 %v866_v9  ;;  %416 = vmatprep.subr.bf16.mxu1 %v887_v19  ;;  %v917_v44 = vld [vmem:[#allocation2 + $0xd4] ss:$8 sps:$4 sm:$0xff]   ;;  %v919_v45 = vld [vmem:[#allocation2 + $0xd0] ss:$8 sps:$4 sm:$0xff]   ;;  %v920_v46 = vld [vmem:[#allocation2 + $0xe4] ss:$8 sps:$4 sm:$0xff]  }
  0x23   :  { %v922_v47 = vld [vmem:[#allocation2 + $0xe0] ss:$8 sps:$4 sm:$0xff]   ;;  %v923_v48 = vld [vmem:[#allocation2 + $0xf4] ss:$8 sps:$4 sm:$0xff]   ;;  %v925_v49 = vld [vmem:[#allocation2 + $0xf0] ss:$8 sps:$4 sm:$0xff]  }
  0x24   :  { %v926_v50 = vld [vmem:[%s1203_s5 + $0x40] sm:$0xff]   ;;  %v928_v52 = vld [vmem:[%s1203_s5 + $0x48] sm:$0xff]   ;;  %v931_v55 = vld [vmem:[%s1203_s5 + $0x10] sm:$0xff]   ;;  %v68_v63 = vshrl.u32 %v67_v62, 7  ;;  %vm999_vm4 = vmmov 0   ;;  %vm677_vm6 = vcmask 523264  }
  0x25   :  { %166 = vmatpush1.bf16.msra.mxu0 %v868_v13  ;;  %417 = vmatpush1.bf16.msra.mxu1 %v889_v22  ;;  %v927_v51 = vld [vmem:[%s1203_s5] sm:$0xff]   ;;  %v929_v53 = vld [vmem:[%s1203_s5 + $0x8] sm:$0xff]   ;;  %v932_v56 = vld [vmem:[%s1203_s5 + $0x58] sm:$0xff]   ;;  %s1000_s30 = smov [#allocation5]  }
  0x26   :  { %167 = vmatprep.subr.bf16.mxu0 %v869_v16  ;;  %418 = vmatprep.subr.bf16.mxu1 %v890_v23  ;;  %v933_v57 = vld [vmem:[%s1203_s5 + $0x18] sm:$0xff]   ;;  %v934_v58 = vld [vmem:[%s1203_s5 + $0x60] sm:$0xff]   ;;  %v936_v60 = vld [vmem:[%s1203_s5 + $0x68] sm:$0xff]   ;;  %v69_v0 = vsub.s32 0, %v68_v63  ;;  %v73_v2 = vsub.s32 1, %v68_v63  ;;  %s728_s10 = sshll.u32 %s1000_s30, 4  ;;  %s729_s10 = int_to_ptr.vmem [resolvable:$true] %s728_s10 }
  0x27   :  { %v935_v59 = vld [vmem:[%s1203_s5 + $0x20] sm:$0xff]   ;;  %v937_v61 = vld [vmem:[%s1203_s5 + $0x28] sm:$0xff]   ;;  %v939_v18 = vld [vmem:[%s1203_s5 + $0x30] sm:$0xff]   ;;  %p973_p9 = scmp.lt.s32.totalorder %s729_s10, %s729_s10 }
  0x28   :  { %v65_v1 = vld [vmem:[%s1200_s2] sm:$0x3]  ;;  %v940_v19 = vld [vmem:[%s1203_s5 + $0x78] sm:$0xff]  }
  0x29   :  { %168 = vmatpush1.bf16.msra.mxu0 %v871_v17  ;;  %419 = vmatpush1.bf16.msra.mxu1 %v892_v26  ;;  %v70_v3 = vrot.slane %v65_v1, %v69_v0  ;;  %v74_v4 = vrot.slane %v65_v1, %v73_v2  ;;  %v938_v17 = vld [vmem:[%s1203_s5 + $0x70] sm:$0xff]   ;;  %v238_v22 = vld [vmem:[%s1202_s4] sm:$0x3] }
  0x2a   :  { %169 = vmatprep.subr.bf16.mxu0 %v872_v20  ;;  %420 = vmatprep.subr.bf16.mxu1 %v893_v27  ;;  %v941_v20 = vld [vmem:[%s1203_s5 + $0x38] sm:$0xff]   ;;  %v243_v23 = vrot.slane %v238_v22, %v69_v0 }
  0x2d   :  { %170 = vmatpush1.bf16.msra.mxu0 %v874_v21  ;;  %421 = vmatpush1.bf16.msra.mxu1 %v895_v29  ;;  %v998_v21 = vmov 0.0  }
  0x2e   :  { %171 = vmatprep.subr.bf16.mxu0 %v875_v24  ;;  %422 = vmatprep.subr.bf16.mxu1 %v896_v30  ;;  %v247_v24 = vrot.slane %v238_v22, %v73_v2 }
  0x31   :  { %172 = vmatpush1.bf16.msra.mxu0 %v877_v25  ;;  %423 = vmatpush1.bf16.msra.mxu1 %v898_v31 }
  0x32   :  { %424 = vmatprep.subr.bf16.mxu1 %v899_v32  ;;  %808 = vmatprep.subr.bf16.mxu0 %v926_v50 }
  0x34   :  { %190 = vmatmul.mubr.bf16.vlgmr.msra.gmra.mrb[0].mxu0 %v48_v28 }
  0x35   :  { %425 = vmatpush1.bf16.msra.mxu1 %v901_v33  ;;  %809 = vmatpush3.bf16.msra.mxu0 %v927_v51  ;;  %v802_v51 = vld [vmem:[%s1206_s8] ss:$0 sm:$0xff] }
  0x36   :  { %426 = vmatprep.subr.bf16.mxu1 %v902_v34  ;;  %810 = vmatprep.subr.bf16.mxu0 %v928_v52 }
  0x39   :  { %427 = vmatpush1.bf16.msra.mxu1 %v904_v35  ;;  %811 = vmatpush3.bf16.msra.mxu0 %v929_v53 }
  0x3a   :  { %428 = vmatprep.subr.bf16.mxu1 %v905_v36  ;;  %812 = vmatprep.subr.bf16.mxu0 %v930_v54  ;;  %v942_v36 = vld [vmem:[%s1205_s7] sm:$0xff]  }
  0x3d   :  { %429 = vmatpush1.bf16.msra.mxu1 %v907_v37  ;;  %813 = vmatpush3.bf16.msra.mxu0 %v931_v55 }
  0x3e   :  { %430 = vmatprep.subr.bf16.mxu1 %v908_v38  ;;  %814 = vmatprep.subr.bf16.mxu0 %v932_v56  ;;  %v943_v38 = vld [vmem:[%s1205_s7 + $0x8] sm:$0xff]  }
  0x41   :  { %431 = vmatpush1.bf16.msra.mxu1 %v910_v39  ;;  %815 = vmatpush3.bf16.msra.mxu0 %v933_v57  ;;  %v944_v39 = vld [vmem:[%s1205_s7 + $0x10] sm:$0xff]  }
  0x42   :  { %432 = vmatprep.subr.bf16.mxu1 %v911_v40  ;;  %816 = vmatprep.subr.bf16.mxu0 %v934_v58  ;;  %v945_v40 = vld [vmem:[%s1205_s7 + $0x18] sm:$0xff]  }
  0x45   :  { %433 = vmatpush1.bf16.msra.mxu1 %v913_v41  ;;  %817 = vmatpush3.bf16.msra.mxu0 %v935_v59 }
  0x46   :  { %434 = vmatprep.subr.bf16.mxu1 %v914_v42  ;;  %818 = vmatprep.subr.bf16.mxu0 %v936_v60  ;;  %v785_v42 = vld [vmem:[%s1204_s6] ss:$0 sm:$0xff]  ;;  %s968_s6 = scalar_lea.vmem %s729_s10, 128 }
  0x47   :  { %p969_p8 = scmp.ne.s32.totalorder %s729_s10, %s968_s6  ;;  %p974_p10 = scmp.lt.s32.totalorder %s968_s6, %s968_s6 }
  0x49   :  { %435 = vmatpush1.bf16.msra.mxu1 %v916_v43  ;;  %819 = vmatpush3.bf16.msra.mxu0 %v937_v61  ;;  %p975_p11 = por %p974_p10, %p973_p9 }
  0x4a   :  { %436 = vmatprep.subr.bf16.mxu1 %v917_v44  ;;  %820 = vmatprep.subr.bf16.mxu0 %v938_v17 }
  0x4b   :  { %p976_p12 = pnand %p975_p11, %p969_p8 }
  0x4d   :  { %437 = vmatpush1.bf16.msra.mxu1 %v919_v45  ;;  %821 = vmatpush3.bf16.msra.mxu0 %v939_v18 }
  0x4e   :  { %438 = vmatprep.subr.bf16.mxu1 %v920_v46  ;;  %822 = vmatprep.subr.bf16.mxu0 %v940_v19 }
  0x51   :  { %439 = vmatpush1.bf16.msra.mxu1 %v922_v47  ;;  %823 = vmatpush3.bf16.msra.mxu0 %v941_v20 }
  0x52   :  { %440 = vmatprep.subr.bf16.mxu1 %v923_v48  ;;  %835 = vmatprep.subr.bf16.mxu0 %v998_v21 }
  0x55   :  { %441 = vmatpush1.bf16.msra.mxu1 %v925_v49 }
 0x107   :  { %v191_v5 = vpop.f32.mrb[0].mxu0 }
 0x108   :  { %v192_v6 = vadd.f32 %v191_v5, %v70_v3  ;;  %v193_v7 = vpop.f32.mrb[1].mxu0 }
 0x109   :  { %v194_v8 = vadd.f32 %v193_v7, %v74_v4  ;;  %v195_v9 = vpop.f32.mrb[2].mxu0 }
 0x10a   :  { %vm198_vm0 = vcmp.gt.f32.partialorder %v192_v6, 0.0  ;;  %v200_v10 = vmul.f32 0.01, %v192_v6  ;;  %v196_v11 = vpop.f32.mrb[3].mxu0 }
 0x10b   :  { %vm199_vm1 = vcmp.gt.f32.partialorder %v194_v8, 0.0  ;;  %v201_v12 = vmul.f32 0.01, %v194_v8 }
 0x10c   :  { %v202_v13 = vsel %vm198_vm0, %v192_v6, %v200_v10 }
 0x10d   :  { %v203_v14 = vsel %vm199_vm1, %v194_v8, %v201_v12  ;;  %v204_v16 = vpack.c.bf16 %v202_v13, %v202_v13 }
 0x10e   :  { %v205_v15 = vpack.c.bf16 %v203_v14, %v203_v14 }
 0x110   :  { %442 = vmatprep.mubr.bf16.mxu1 %v205_v15 }
 0x111   :  { %443 = vmatmul.mubr.bf16.vlgmr.msra.gmra.mrb[0].mxu1 %v204_v16 }
 0x1e4   :  { %v444_v25 = vpop.f32.mrb[0].mxu1 }
 0x1e5   :  { %v445_v26 = vadd.f32 %v444_v25, %v243_v23  ;;  %v446_v27 = vpop.f32.mrb[1].mxu1 }
 0x1e6   :  { %v447_v28 = vadd.f32 %v446_v27, %v247_v24  ;;  %v448_v29 = vpop.f32.mrb[2].mxu1 }
 0x1e7   :  { %vm451_vm2 = vcmp.gt.f32.partialorder %v445_v26, 0.0  ;;  %v453_v30 = vmul.f32 0.01, %v445_v26  ;;  %v449_v31 = vpop.f32.mrb[3].mxu1 }
 0x1e8   :  { %vm452_vm3 = vcmp.gt.f32.partialorder %v447_v28, 0.0  ;;  %v454_v32 = vmul.f32 0.01, %v447_v28 }
 0x1e9   :  { %v455_v33 = vsel %vm451_vm2, %v445_v26, %v453_v30 }
 0x1ea   :  { %v456_v34 = vsel %vm452_vm3, %v447_v28, %v454_v32  ;;  %v457_v37 = vpack.c.bf16 %v455_v33, %v455_v33 }
 0x1eb   :  { %v458_v35 = vpack.c.bf16 %v456_v34, %v456_v34 }
 0x1ed   :  { %626 = vmatprep.mubr.bf16.mxu0 %v458_v35 }
 0x1ee   :  { %627 = vmatmul.mubr.bf16.vlgmr.msra.gmra.mrb[4].mxu0 %v457_v37 }
 0x1ef   :  { %836 = vmatpush3.bf16.msra.mxu0 %v942_v36  ;;  %843 = vmatprep.mubr.msk.bf16.mxu0 %vm999_vm4, %v998_v21 }
 0x1f0   :  { %837 = vmatprep.subr.bf16.mxu0 %v998_v21 }
 0x1f3   :  { %838 = vmatpush3.bf16.msra.mxu0 %v943_v38 }
 0x1f4   :  { %839 = vmatprep.subr.bf16.mxu0 %v998_v21 }
 0x1f7   :  { %840 = vmatpush3.bf16.msra.mxu0 %v944_v39 }
 0x1f8   :  { %841 = vmatprep.subr.bf16.mxu0 %v998_v21 }
 0x1fb   :  { %842 = vmatpush3.bf16.msra.mxu0 %v945_v40 }
 0x2c1   :  { %v824_v41 = vpop.f32.mrb[4].mxu0 }
 0x2c2   :  { %v825_v43 = vpop.f32.mrb[5].mxu0 }
 0x2c3   :  { %v826_v44 = vadd.f32 %v825_v43, %v824_v41  ;;  %v827_v45 = vpop.f32.mrb[6].mxu0 }
 0x2c4   :  { %v828_v46 = vpop.f32.mrb[7].mxu0 }
 0x2c5   :  { %v629_v47 = vadd.f32 %v826_v44, %v785_v42 }
 0x2c7   :  { %vm634_vm5 = vcmp.gt.f32.partialorder %v629_v47, 0.0  ;;  %v635_v48 = vmul.f32 0.01, %v629_v47 }
 0x2c9   :  { %v636_v49 = vsel %vm634_vm5, %v629_v47, %v635_v48 }
 0x2ca   :  { %v637_v50 = vpack.c.bf16 %v636_v49, %v636_v49 }
 0x2cc   :  { %844 = vmatmul.mubr.msk.bf16.vlgmr.msra.gmra.mrb[8].mxu0 %vm677_vm6, %v637_v50 }
 0x39f   :  { %v715_v52 = vpop.f32.mrb[8].mxu0 }
 0x3a0   :  { %v716_v53 = vadd.f32 %v802_v51, %v715_v52  ;;  %v845_v54 = vpop.f32.mrb[9].mxu0 }
 0x3a1   :  { %v718_v55 = vpop.f32.mrb[10].mxu0 }
 0x3a2   :  { %721 = vst [vmem:[#allocation5] sm:$0xff] %v716_v53  ;;  %v846_v56 = vpop.f32.mrb[11].mxu0 }
 0x3a3   :  { %979 = shalt.err (!%p976_p12)
}
 0x3a4   :  { %s980_s8 = scalar_lea.hbm %s1207_s9, 128 }
 0x3a5   :  { %p981_p13 = scmp.ne.s32.totalorder %s1207_s9, %s980_s8  ;;  %p984_p0 = scmp.lt.u32.totalorder %s980_s8, %s1207_s9 }
 0x3a7   :  { %p986_p1 = pnand %p984_p0, %p981_p13 }
 0x3a9   :  { %989 = shalt.err (!%p986_p1)
}
 0x3aa   :  { %731 = dma.vmem_to_hbm [thread:$0]  %s729_s10, 128, %s1207_s9, [#allocation4]  }
 0x3ab   :  { %992 = dma.done.wait [#allocation4], 128  }
 0x3ac   :  { %993 = vsyncadd [#allocation4], 4294967168 }
 0x3ad   :  { %735 = vsyncpa [#allocation3], 1 }
 0x3ae   :  { %736 = vsyncpa [#allocation4], 1 }

</bundles_post_ra>
